<compile_context>
chip_gen: v6e
topology: v6e:2x2x1
jax: 0.10.0
libtpu: 0.0.40
codegen_flags: <defaults>
</compile_context>

<pallas_src>
import functools

import jax
import jax.numpy as jnp
from jax import lax
from jax.experimental import pallas as pl
from jax.experimental.pallas import tpu as pltpu

_LANES = 128
_SUBLANES = 8


def _fused_ce_kernel(cls_logits_ref, cls_labels_ref, len_logits_ref,
                     len_labels_ref, out_ref, *, n_cls_rows):
    """One row-tile of the character CE + (tile 0 only) the whole length CE.

    Writes a (1, 8, 128) partial slab:
      [0,0,0] = cls loss sum   [0,0,1] = cls valid count
      [0,0,2] = len loss sum   [0,0,3] = len valid count   (non-zero on tile 0)
    """
    i = pl.program_id(0)

    # ---------------- character-class cross entropy (this row tile) --------
    logits = cls_logits_ref[...].astype(jnp.float32)            # (TM, C)
    labels = cls_labels_ref[...]                                 # (TM, 1) int32
    tm, c = logits.shape

    # Valid rows: real (non-padded) rows whose label is an in-range class id.
    # ignore_index == -1 and any out-of-range label contribute nothing.
    row_idx = i * tm + lax.broadcasted_iota(jnp.int32, (tm, 1), 0)
    valid = (labels >= 0) & (labels < c) & (row_idx < n_cls_rows)

    # Numerically stable softmax pieces along the class (lane) axis.
    m = jnp.max(logits, axis=-1, keepdims=True)
    shifted = logits - m                                         # reused below
    sumexp = jnp.sum(jnp.exp(shifted), axis=-1, keepdims=True)

    # Select-based gather of the target-class (shifted) logit — selects, not
    # multiplies, so garbage/NaN in padded boundary rows never propagates.
    cls_iota = lax.broadcasted_iota(jnp.int32, (tm, c), 1)
    true_shift = jnp.sum(jnp.where(cls_iota == labels, shifted, 0.0),
                         axis=-1, keepdims=True)
    # per-row NLL = lse - x_t = log(sumexp) - (x_t - m)
    per_row = jnp.where(valid, jnp.log(sumexp) - true_shift, 0.0)
    cls_sum = jnp.sum(per_row)
    cls_cnt = jnp.sum(valid.astype(jnp.float32))
    # TODO(synk): if the bundle dump shows VALU saturation on v7x, the C-axis
    # gather/reduction could be offloaded to the idle MXU (one-hot matmul with
    # f32 accumulate) — kept on the VPU here for exactness.

    # Lane/sublane-dense partial slab skeleton (lanes 2/3 default to 0).
    lane = lax.broadcasted_iota(jnp.int32, (_SUBLANES, _LANES), 1)
    sub = lax.broadcasted_iota(jnp.int32, (_SUBLANES, _LANES), 0)
    row0 = sub == 0
    cls_slab = jnp.where(row0 & (lane == 0), cls_sum,
               jnp.where(row0 & (lane == 1), cls_cnt, 0.0))

    # ---------------- length cross entropy: tile 0 only --------------------
    @pl.when(i == 0)
    def _with_len():
        len_logits = len_logits_ref[...].astype(jnp.float32)    # (B, L)
        len_labels = len_labels_ref[...]                         # (B, 1) int32
        b, l = len_logits.shape

        lm = jnp.max(len_logits, axis=-1, keepdims=True)
        lshift = len_logits - lm
        lsum = jnp.sum(jnp.exp(lshift), axis=-1, keepdims=True)
        liota = lax.broadcasted_iota(jnp.int32, (b, l), 1)
        ltrue = jnp.sum(jnp.where(liota == len_labels, lshift, 0.0),
                        axis=-1, keepdims=True)
        # Folds the original `gtlen[gtlen >= L] = -1` clamp: labels outside
        # [0, L) (including -1) are ignored.
        lvalid = (len_labels >= 0) & (len_labels < l)
        lper = jnp.where(lvalid, jnp.log(lsum) - ltrue, 0.0)
        len_sum = jnp.sum(lper)
        len_cnt = jnp.sum(lvalid.astype(jnp.float32))

        len_slab = jnp.where(row0 & (lane == 2), len_sum,
                   jnp.where(row0 & (lane == 3), len_cnt, 0.0))
        out_ref[0] = (cls_slab + len_slab).astype(out_ref.dtype)

    @pl.when(i != 0)
    def _cls_only():
        out_ref[0] = cls_slab.astype(out_ref.dtype)


def _round_up(x, m):
    return ((x + m - 1) // m) * m


def _tile_params(n_rows, n_classes, in_itemsize, len_bytes):
    """Row tile, grid size and VMEM limit sized against the REAL working set.

    Per streamed row the kernel touches roughly:
      2 * C * in_itemsize   (double-buffered HBM->VMEM input slab)
      ~3 * C * 4            (f32 upcast / exp / iota-select temporaries)
    """
    bytes_per_row = n_classes * (2 * in_itemsize + 12) + 2 * 4   # + label col
    try:
        vmem_cap = int(pltpu.get_tpu_info().vmem_capacity_bytes)
    except Exception:
        vmem_cap = 64 * 1024 * 1024          # conservative: v7x per-TC VMEM

    # Working-set budget: bigger on the 128 MiB generations (HBM-bound v5e/
    # v6e benefit from large tiles), tighter on v7x (64 MiB per TC).
    budget = vmem_cap // 4
    tm = budget // max(1, bytes_per_row)
    tm = max(_SUBLANES, (tm // _SUBLANES) * _SUBLANES)
    tm_cap = 2048 if vmem_cap >= (100 << 20) else 1024
    tm = min(tm, tm_cap)
    tm = min(tm, _round_up(n_rows, _SUBLANES))        # never bigger than input
    if n_rows > _SUBLANES:
        # Guarantee >= 2 tiles so v7x's two TensorCores both get work under
        # dimension_semantics=("parallel",).  Near-free on v5e/v6e.
        tm = min(tm, _round_up(pl.cdiv(n_rows, 2), _SUBLANES))
    tm = max(tm, _SUBLANES)
    num_tiles = pl.cdiv(n_rows, tm)

    working = (tm * bytes_per_row                      # streamed tile + temps
               + 2 * len_bytes                         # resident length blocks
               + 2 * _SUBLANES * _LANES * 4)           # output slab
    vmem_limit = int(working) + (4 << 20)              # headroom for Mosaic
    vmem_limit = max(16 << 20, min(vmem_limit, (vmem_cap * 3) // 4))
    return tm, num_tiles, vmem_limit


def osocr_loss_ng(outcls, lencls, label_flatten, gtlen):
    """Forward pass of osocrlossNG (ignore_index=-1, reduction='mean')."""
    outcls = jnp.asarray(outcls)
    lencls = jnp.asarray(lencls)
    cls_labels = jnp.asarray(label_flatten, jnp.int32).reshape(-1, 1)
    len_labels = jnp.asarray(gtlen, jnp.int32).reshape(-1, 1)

    n, c = outcls.shape
    b, l = lencls.shape
    # TODO(synk): for tiny vocabularies (C < 128) the (TM, C) tile uses only
    # C/128 of each vreg's lanes; a wrapper-side re-layout (N on lanes) would
    # be needed to recover lane utilization — not done here.
    len_bytes = b * l * lencls.dtype.itemsize + b * 4
    tm, num_tiles, vmem_limit = _tile_params(n, c, outcls.dtype.itemsize,
                                             len_bytes)

    kernel = functools.partial(_fused_ce_kernel, n_cls_rows=n)

    cost = pl.CostEstimate(
        flops=6 * n * c + 6 * b * l,
        transcendentals=n * c + n + b * l + b,
        bytes_accessed=(n * c * outcls.dtype.itemsize + n * 4
                        + b * l * lencls.dtype.itemsize + b * 4
                        + num_tiles * _SUBLANES * _LANES * 4),
    )

    partials = pl.pallas_call(
        kernel,
        out_shape=jax.ShapeDtypeStruct((num_tiles, _SUBLANES, _LANES),
                                       jnp.float32),
        grid_spec=pltpu.PrefetchScalarGridSpec(
            num_scalar_prefetch=0,
            grid=(num_tiles,),
            in_specs=[
                pl.BlockSpec((tm, c), lambda i: (i, 0)),   # char logits tile
                pl.BlockSpec((tm, 1), lambda i: (i, 0)),   # char labels tile
                pl.BlockSpec((b, l), lambda i: (0, 0)),    # length logits (resident)
                pl.BlockSpec((b, 1), lambda i: (0, 0)),    # length labels (resident)
            ],
            out_specs=pl.BlockSpec((1, _SUBLANES, _LANES),
                                   lambda i: (i, 0, 0)),
        ),
        compiler_params=pltpu.CompilerParams(
            dimension_semantics=("parallel",),             # shard tiles on v7x's 2 TCs
            vmem_limit_bytes=vmem_limit,
        ),
        cost_estimate=cost,
    )(outcls, cls_labels, lencls, len_labels)

    # Single tiny combine: sum the 4 partial lanes across tiles at once.
    sums = jnp.sum(partials[:, 0, :4], axis=0)
    cls_sum, cls_cnt, len_sum, len_cnt = sums[0], sums[1], sums[2], sums[3]

    clsloss = cls_sum / cls_cnt
    lenloss = len_sum / len_cnt
    total = lenloss + clsloss
    # TODO(synk): the PyTorch module returns .item() (host floats) in the dict;
    # here they stay as JAX scalars.
    return total, {"cls_loss": clsloss, "len_loss": lenloss}


def _reference(outcls, lencls, label_flatten, gtlen_):
    """Pure-JAX reference for correctness checking."""
    def ce(logits, labels):
        logits = jnp.asarray(logits, jnp.float32)
        labels = jnp.asarray(labels, jnp.int32)
        logp = jax.nn.log_softmax(logits, axis=-1)
        valid = labels != -1
        safe = jnp.where(valid, labels, 0)
        nll = -jnp.take_along_axis(logp, safe[:, None], axis=-1)[:, 0]
        nll = jnp.where(valid, nll, 0.0)
        return jnp.sum(nll) / jnp.sum(valid.astype(jnp.float32))

    cls = ce(outcls, label_flatten)
    g = jnp.asarray(gtlen_, jnp.int32)
    g = jnp.where(g >= lencls.shape[-1], -1, g)
    length = ce(lencls, g)
    return length + cls, cls, length


if __name__ == "__main__":
    key = jax.random.PRNGKey(0)
    k1, k2, k3, k4 = jax.random.split(key, 4)

    # Small shapes consistent with the module's forward:
    #   outcls:        (N_tokens, n_classes) character logits (already flattened)
    #   label_flatten: (N_tokens,)            character labels, -1 = ignore
    #   lencls:        (batch, max_len)       length logits
    #   gtlen:         (batch,)               ground-truth lengths (may exceed max_len)
    n_tokens, n_classes = 16, 32
    batch, max_len = 2, 8

    outcls = jax.random.normal(k1, (n_tokens, n_classes), dtype=jnp.float32)
    label_flatten = jax.random.randint(k2, (n_tokens,), 0, n_classes, dtype=jnp.int32)
    label_flatten = label_flatten.at[3].set(-1).at[11].set(-1)   # ignored entries
    lencls = jax.random.normal(k3, (batch, max_len), dtype=jnp.float32)
    gtlen = jax.random.randint(k4, (batch,), 0, max_len, dtype=jnp.int32)
    gtlen = gtlen.at[1].set(max_len + 3)   # triggers the >= max_len -> ignore clamp

    fwd = jax.jit(osocr_loss_ng)
    total, parts = fwd(outcls, lencls, label_flatten, gtlen)
    total = jax.block_until_ready(total)

    ref_total, ref_cls, ref_len = _reference(outcls, lencls, label_flatten, gtlen)
    assert jnp.allclose(total, ref_total, atol=1e-5, rtol=1e-5), (total, ref_total)
    assert jnp.allclose(parts["cls_loss"], ref_cls, atol=1e-5, rtol=1e-5)
    assert jnp.allclose(parts["len_loss"], ref_len, atol=1e-5, rtol=1e-5)

    print("KERNEL_OK")
</pallas_src>

<mosaic_0001>
module attributes {stable_mosaic.version = 11 : i64} {
  func.func @_fused_ce_kernel(%arg0: i32, %arg1: memref<8x32xf32, #tpu.memory_space<vmem>>, %arg2: memref<8x1xi32, #tpu.memory_space<vmem>>, %arg3: memref<2x8xf32, #tpu.memory_space<vmem>>, %arg4: memref<2x1xi32, #tpu.memory_space<vmem>>, %arg5: memref<1x8x128xf32, #tpu.memory_space<vmem>>) attributes {dimension_semantics = [#tpu.dimension_semantics<parallel>], iteration_bounds = array<i64: 2>, scalar_prefetch = 0 : i64, scratch_operands = 0 : i64, tpu.core_type = #tpu.core_type<tc>, window_params = [{transform_indices = @transform_0, window_bounds = array<i64: 8, 32>}, {transform_indices = @transform_1, window_bounds = array<i64: 8, 1>}, {pipeline_mode = #tpu.pipeline_mode<synchronous>, transform_indices = @transform_2, window_bounds = array<i64: 2, 8>}, {pipeline_mode = #tpu.pipeline_mode<synchronous>, transform_indices = @transform_3, window_bounds = array<i64: 2, 1>}, {transform_indices = @transform_4, window_bounds = array<i64: 1, 8, 128>}]} {
    %c0 = arith.constant 0 : index
    %c0_0 = arith.constant 0 : index
    %0 = vector.load %arg1[%c0, %c0_0] : memref<8x32xf32, #tpu.memory_space<vmem>>, vector<8x32xf32>
    %c0_1 = arith.constant 0 : index
    %c0_2 = arith.constant 0 : index
    %1 = vector.load %arg2[%c0_1, %c0_2] : memref<8x1xi32, #tpu.memory_space<vmem>>, vector<8x1xi32>
    %c8_i32 = arith.constant 8 : i32
    %2 = arith.muli %arg0, %c8_i32 : i32
    %3 = tpu.iota {dimensions = array<i32: 0>} : vector<8x1xi32>
    %4 = vector.broadcast %2 : i32 to vector<8x1xi32>
    %5 = arith.addi %4, %3 : vector<8x1xi32>
    %c0_i32 = arith.constant 0 : i32
    %6 = vector.broadcast %c0_i32 : i32 to vector<8x1xi32>
    %7 = arith.cmpi sge, %1, %6 : vector<8x1xi32>
    %c32_i32 = arith.constant 32 : i32
    %8 = vector.broadcast %c32_i32 : i32 to vector<8x1xi32>
    %9 = arith.cmpi slt, %1, %8 : vector<8x1xi32>
    %10 = arith.andi %7, %9 : vector<8x1xi1>
    %c16_i32 = arith.constant 16 : i32
    %11 = vector.broadcast %c16_i32 : i32 to vector<8x1xi32>
    %12 = arith.cmpi slt, %5, %11 : vector<8x1xi32>
    %13 = arith.andi %10, %12 : vector<8x1xi1>
    %cst = arith.constant dense<0xFF800000> : vector<8xf32>
    %14 = vector.multi_reduction <maximumf>, %0, %cst [1] : vector<8x32xf32> to vector<8xf32>
    %15 = vector.shape_cast %14 : vector<8xf32> to vector<8x1xf32>
    %16 = vector.broadcast %15 : vector<8x1xf32> to vector<8x32xf32>
    %17 = arith.subf %0, %16 : vector<8x32xf32>
    %18 = math.exp %17 : vector<8x32xf32>
    %cst_3 = arith.constant dense<0.000000e+00> : vector<8xf32>
    %19 = vector.multi_reduction <add>, %18, %cst_3 [1] : vector<8x32xf32> to vector<8xf32>
    %20 = vector.shape_cast %19 : vector<8xf32> to vector<8x1xf32>
    %21 = tpu.iota {dimensions = array<i32: 1>} : vector<8x32xi32>
    %22 = vector.broadcast %1 : vector<8x1xi32> to vector<8x32xi32>
    %23 = arith.cmpi eq, %21, %22 : vector<8x32xi32>
    %cst_4 = arith.constant 0.000000e+00 : f32
    %24 = vector.broadcast %cst_4 : f32 to vector<8x32xf32>
    %25 = arith.select %23, %17, %24 : vector<8x32xi1>, vector<8x32xf32>
    %cst_5 = arith.constant dense<0.000000e+00> : vector<8xf32>
    %26 = vector.multi_reduction <add>, %25, %cst_5 [1] : vector<8x32xf32> to vector<8xf32>
    %27 = vector.shape_cast %26 : vector<8xf32> to vector<8x1xf32>
    %28 = math.log %20 : vector<8x1xf32>
    %29 = arith.subf %28, %27 : vector<8x1xf32>
    %cst_6 = arith.constant 0.000000e+00 : f32
    %30 = vector.broadcast %cst_6 : f32 to vector<8x1xf32>
    %31 = arith.select %13, %29, %30 : vector<8x1xi1>, vector<8x1xf32>
    %32 = vector.shape_cast %31 : vector<8x1xf32> to vector<1x8x1xf32>
    %cst_7 = arith.constant dense<0.000000e+00> : vector<1xf32>
    %33 = vector.multi_reduction <add>, %32, %cst_7 [1, 2] : vector<1x8x1xf32> to vector<1xf32>
    %34 = vector.shape_cast %33 : vector<1xf32> to vector<1x1x1xf32>
    %35 = vector.extract %34[0, 0, 0] : f32 from vector<1x1x1xf32>
    %36 = arith.extui %13 : vector<8x1xi1> to vector<8x1xi32>
    %37 = arith.sitofp %36 : vector<8x1xi32> to vector<8x1xf32>
    %38 = vector.shape_cast %37 : vector<8x1xf32> to vector<1x8x1xf32>
    %cst_8 = arith.constant dense<0.000000e+00> : vector<1xf32>
    %39 = vector.multi_reduction <add>, %38, %cst_8 [1, 2] : vector<1x8x1xf32> to vector<1xf32>
    %40 = vector.shape_cast %39 : vector<1xf32> to vector<1x1x1xf32>
    %41 = vector.extract %40[0, 0, 0] : f32 from vector<1x1x1xf32>
    %42 = tpu.iota {dimensions = array<i32: 1>} : vector<8x128xi32>
    %43 = tpu.iota {dimensions = array<i32: 0>} : vector<8x128xi32>
    %c0_i32_9 = arith.constant 0 : i32
    %44 = vector.broadcast %c0_i32_9 : i32 to vector<8x128xi32>
    %45 = arith.cmpi eq, %43, %44 : vector<8x128xi32>
    %c0_i32_10 = arith.constant 0 : i32
    %46 = vector.broadcast %c0_i32_10 : i32 to vector<8x128xi32>
    %47 = arith.cmpi eq, %42, %46 : vector<8x128xi32>
    %48 = arith.andi %45, %47 : vector<8x128xi1>
    %c1_i32 = arith.constant 1 : i32
    %49 = vector.broadcast %c1_i32 : i32 to vector<8x128xi32>
    %50 = arith.cmpi eq, %42, %49 : vector<8x128xi32>
    %51 = arith.andi %45, %50 : vector<8x128xi1>
    %cst_11 = arith.constant 0.000000e+00 : f32
    %52 = vector.broadcast %41 : f32 to vector<8x128xf32>
    %53 = vector.broadcast %cst_11 : f32 to vector<8x128xf32>
    %54 = arith.select %51, %52, %53 : vector<8x128xi1>, vector<8x128xf32>
    %55 = vector.broadcast %35 : f32 to vector<8x128xf32>
    %56 = arith.select %48, %55, %54 : vector<8x128xi1>, vector<8x128xf32>
    %c0_i32_12 = arith.constant 0 : i32
    %57 = arith.cmpi eq, %arg0, %c0_i32_12 : i32
    %58 = arith.extui %57 : i1 to i32
    %c0_i32_13 = arith.constant 0 : i32
    %59 = arith.cmpi ne, %58, %c0_i32_13 : i32
    scf.if %59 {
      %c0_16 = arith.constant 0 : index
      %c0_17 = arith.constant 0 : index
      %63 = vector.load %arg3[%c0_16, %c0_17] : memref<2x8xf32, #tpu.memory_space<vmem>>, vector<2x8xf32>
      %c0_18 = arith.constant 0 : index
      %c0_19 = arith.constant 0 : index
      %64 = vector.load %arg4[%c0_18, %c0_19] : memref<2x1xi32, #tpu.memory_space<vmem>>, vector<2x1xi32>
      %cst_20 = arith.constant dense<0xFF800000> : vector<2xf32>
      %65 = vector.multi_reduction <maximumf>, %63, %cst_20 [1] : vector<2x8xf32> to vector<2xf32>
      %66 = vector.shape_cast %65 : vector<2xf32> to vector<2x1xf32>
      %67 = vector.broadcast %66 : vector<2x1xf32> to vector<2x8xf32>
      %68 = arith.subf %63, %67 : vector<2x8xf32>
      %69 = math.exp %68 : vector<2x8xf32>
      %cst_21 = arith.constant dense<0.000000e+00> : vector<2xf32>
      %70 = vector.multi_reduction <add>, %69, %cst_21 [1] : vector<2x8xf32> to vector<2xf32>
      %71 = vector.shape_cast %70 : vector<2xf32> to vector<2x1xf32>
      %72 = tpu.iota {dimensions = array<i32: 1>} : vector<2x8xi32>
      %73 = vector.broadcast %64 : vector<2x1xi32> to vector<2x8xi32>
      %74 = arith.cmpi eq, %72, %73 : vector<2x8xi32>
      %cst_22 = arith.constant 0.000000e+00 : f32
      %75 = vector.broadcast %cst_22 : f32 to vector<2x8xf32>
      %76 = arith.select %74, %68, %75 : vector<2x8xi1>, vector<2x8xf32>
      %cst_23 = arith.constant dense<0.000000e+00> : vector<2xf32>
      %77 = vector.multi_reduction <add>, %76, %cst_23 [1] : vector<2x8xf32> to vector<2xf32>
      %78 = vector.shape_cast %77 : vector<2xf32> to vector<2x1xf32>
      %c0_i32_24 = arith.constant 0 : i32
      %79 = vector.broadcast %c0_i32_24 : i32 to vector<2x1xi32>
      %80 = arith.cmpi sge, %64, %79 : vector<2x1xi32>
      %c8_i32_25 = arith.constant 8 : i32
      %81 = vector.broadcast %c8_i32_25 : i32 to vector<2x1xi32>
      %82 = arith.cmpi slt, %64, %81 : vector<2x1xi32>
      %83 = arith.andi %80, %82 : vector<2x1xi1>
      %84 = math.log %71 : vector<2x1xf32>
      %85 = arith.subf %84, %78 : vector<2x1xf32>
      %cst_26 = arith.constant 0.000000e+00 : f32
      %86 = vector.broadcast %cst_26 : f32 to vector<2x1xf32>
      %87 = arith.select %83, %85, %86 : vector<2x1xi1>, vector<2x1xf32>
      %88 = vector.shape_cast %87 : vector<2x1xf32> to vector<1x2x1xf32>
      %cst_27 = arith.constant dense<0.000000e+00> : vector<1xf32>
      %89 = vector.multi_reduction <add>, %88, %cst_27 [1, 2] : vector<1x2x1xf32> to vector<1xf32>
      %90 = vector.shape_cast %89 : vector<1xf32> to vector<1x1x1xf32>
      %91 = vector.extract %90[0, 0, 0] : f32 from vector<1x1x1xf32>
      %92 = arith.extui %83 : vector<2x1xi1> to vector<2x1xi32>
      %93 = arith.sitofp %92 : vector<2x1xi32> to vector<2x1xf32>
      %94 = vector.shape_cast %93 : vector<2x1xf32> to vector<1x2x1xf32>
      %cst_28 = arith.constant dense<0.000000e+00> : vector<1xf32>
      %95 = vector.multi_reduction <add>, %94, %cst_28 [1, 2] : vector<1x2x1xf32> to vector<1xf32>
      %96 = vector.shape_cast %95 : vector<1xf32> to vector<1x1x1xf32>
      %97 = vector.extract %96[0, 0, 0] : f32 from vector<1x1x1xf32>
      %c2_i32 = arith.constant 2 : i32
      %98 = vector.broadcast %c2_i32 : i32 to vector<8x128xi32>
      %99 = arith.cmpi eq, %42, %98 : vector<8x128xi32>
      %100 = arith.andi %45, %99 : vector<8x128xi1>
      %c3_i32 = arith.constant 3 : i32
      %101 = vector.broadcast %c3_i32 : i32 to vector<8x128xi32>
      %102 = arith.cmpi eq, %42, %101 : vector<8x128xi32>
      %103 = arith.andi %45, %102 : vector<8x128xi1>
      %cst_29 = arith.constant 0.000000e+00 : f32
      %104 = vector.broadcast %97 : f32 to vector<8x128xf32>
      %105 = vector.broadcast %cst_29 : f32 to vector<8x128xf32>
      %106 = arith.select %103, %104, %105 : vector<8x128xi1>, vector<8x128xf32>
      %107 = vector.broadcast %91 : f32 to vector<8x128xf32>
      %108 = arith.select %100, %107, %106 : vector<8x128xi1>, vector<8x128xf32>
      %109 = arith.addf %56, %108 : vector<8x128xf32>
      %c0_30 = arith.constant 0 : index
      %c0_31 = arith.constant 0 : index
      %c0_32 = arith.constant 0 : index
      %110 = vector.load %arg5[%c0_30, %c0_31, %c0_32] : memref<1x8x128xf32, #tpu.memory_space<vmem>>, vector<1x8x128xf32>
      %111 = vector.shape_cast %110 : vector<1x8x128xf32> to vector<8x128xf32>
      %112 = vector.shape_cast %109 : vector<8x128xf32> to vector<1x8x128xf32>
      tpu.vector_store %arg5[%c0_30, %c0_31, %c0_32], %112 {strides = array<i32>} : memref<1x8x128xf32, #tpu.memory_space<vmem>>, vector<1x8x128xf32>,
    } else {
    }
    %c0_i32_14 = arith.constant 0 : i32
    %60 = arith.cmpi ne, %arg0, %c0_i32_14 : i32
    %61 = arith.extui %60 : i1 to i32
    %c0_i32_15 = arith.constant 0 : i32
    %62 = arith.cmpi ne, %61, %c0_i32_15 : i32
    scf.if %62 {
      %c0_16 = arith.constant 0 : index
      %c0_17 = arith.constant 0 : index
      %c0_18 = arith.constant 0 : index
      %63 = vector.load %arg5[%c0_16, %c0_17, %c0_18] : memref<1x8x128xf32, #tpu.memory_space<vmem>>, vector<1x8x128xf32>
      %64 = vector.shape_cast %63 : vector<1x8x128xf32> to vector<8x128xf32>
      %65 = vector.shape_cast %56 : vector<8x128xf32> to vector<1x8x128xf32>
      tpu.vector_store %arg5[%c0_16, %c0_17, %c0_18], %65 {strides = array<i32>} : memref<1x8x128xf32, #tpu.memory_space<vmem>>, vector<1x8x128xf32>,
    } else {
    }
    return
  }
  func.func @transform_0(%arg0: i32) -> (i32, i32) {
    %c0_i32 = arith.constant 0 : i32
    %c0_i32_0 = arith.constant 0 : i32
    return %arg0, %c0_i32 : i32, i32
  }
  func.func @transform_1(%arg0: i32) -> (i32, i32) {
    %c0_i32 = arith.constant 0 : i32
    %c0_i32_0 = arith.constant 0 : i32
    return %arg0, %c0_i32 : i32, i32
  }
  func.func @transform_2(%arg0: i32) -> (i32, i32) {
    %c0_i32 = arith.constant 0 : i32
    %c0_i32_0 = arith.constant 0 : i32
    %c0_i32_1 = arith.constant 0 : i32
    return %c0_i32, %c0_i32_0 : i32, i32
  }
  func.func @transform_3(%arg0: i32) -> (i32, i32) {
    %c0_i32 = arith.constant 0 : i32
    %c0_i32_0 = arith.constant 0 : i32
    %c0_i32_1 = arith.constant 0 : i32
    return %c0_i32, %c0_i32_0 : i32, i32
  }
  func.func @transform_4(%arg0: i32) -> (i32, i32, i32) {
    %c0_i32 = arith.constant 0 : i32
    %c0_i32_0 = arith.constant 0 : i32
    %c0_i32_1 = arith.constant 0 : i32
    return %arg0, %c0_i32, %c0_i32_0 : i32, i32, i32
  }
}

</mosaic_0001>

<bundles_post_ra>
// kernel: osocr_loss_ng.1
= control target key start
LH: loop header
LB: loop body
LE: loop exit
PB: predicated region body
PF: predicated region fallthrough
CT: control target
= control target key end

     0   :  { %s494_s15 = smov 0   ;;  %s561_s0 = inlined_call_operand.vmem [shape: f32[16,32], index: 0, kind: input, shape index: {}]   ;;  %s562_s1 = inlined_call_operand.vmem [shape: s32[16,1], index: 1, kind: input, shape index: {}]   ;;  %s563_s2 = inlined_call_operand.vmem [shape: f32[2,8], index: 2, kind: input, shape index: {}]   ;;  %s564_s3 = inlined_call_operand.vmem [shape: s32[2,1], index: 3, kind: input, shape index: {}]   ;;  %s565_s4 = inlined_call_operand.vmem [shape: f32[2,8,128], index: 4, kind: output, shape index: {}]  }
   0x1 LB: > { %s500_s16 = sadd.s32 4294967295, %s463_s15   ;;  %p416_p0 = scmp.ge.s32.totalorder %s463_s15, 1  ;;  %s463_s15 = sphi %s494_s15, %s14_s15  }
   0x2   : > { %p170_p1 = scmp.lt.s32.totalorder %s463_s15, 3 }
   0x4   : > { %p171_p2 = pnand %p416_p0, %p170_p1 }
   0x5   : > { %p198_p3 = scmp.lt.s32.totalorder (!%p171_p2), %s500_s16, 1  ;;  %s420_s28 = sshll.u32 (!%p171_p2), %s500_s16, 3 }
   0x6   : > { %174 = sbr.rel (%p171_p2) target bundleno = 1074 (0x432), region = 36  ;;  %p422_p4 = scmp.ne.s32.totalorder (!%p171_p2), %s500_s16, 0 }
   0xb   : > { %v465_v0 = vmov 0   ;;  %s199_s17 = scalar_select %p198_p3, %s500_s16, 1  ;;  %vm222_vm0 = vcmask 261120   ;;  %v213_v7 = vlaneseq  ;;  %v215_v16 = vstv %s420_s28 }
   0xc   : > { %447 = vset.pattern.permute.xlu0 %v465_v0  ;;  %vm246_vm7 = vcmask 7168   ;;  %v466_v23 = vmov 0.0  }
   0xd   : > { %s417_s18 = sshll.u32 %s199_s17, 3  ;;  %v518_v8 = vand.u32 127, %v213_v7  ;;  %v524_v15 = vshrl.u32 %v213_v7, 7 }
   0xe   : > { %s201_s21 = scalar_lea.vmem %s561_s0, %s417_s18  ;;  %s512_s24 = scalar_lea.vmem %s565_s4, %s417_s18 }
   0xf   : > { %v210_v1 = vld [vmem:[%s201_s21] sm:$0xff]  ;;  %s205_s27 = scalar_lea.vmem %s562_s1, %s417_s18  ;;  %v216_v17 = vadd.s32 %v215_v16, %v524_v15  ;;  %vm269_vm8 = vcmp.eq.s32.totalorder %v524_v15, 0  ;;  %vm272_vm9 = vcmp.eq.s32.totalorder %v518_v8, 1  ;;  %vm270_vm10 = vcmp.eq.s32.totalorder %v518_v8, 0 }
  0x10   : > { %v223_v2 = vsel %vm222_vm0, %v210_v1, -inf  ;;  %v211_v3 = vld [vmem:[%s205_s27] sm:$0xff]  ;;  %vm273_vm11 = vmand %vm269_vm8, %vm272_vm9 }
  0x11   : > { %224 = vmax.xlane.f32.xlu0 %v223_v2  ;;  %vm217_vm2 = vcmp.ge.s32.totalorder %v211_v3, 0  ;;  %vm218_vm3 = vcmp.lt.s32.totalorder %v211_v3, 32  ;;  %vm220_vm5 = vcmp.lt.s32.totalorder %v216_v17, 16  ;;  %vm271_vm12 = vmand %vm269_vm8, %vm270_vm10 }
  0x12   : > { %vm219_vm4 = vmand %vm217_vm2, %vm218_vm3 }
  0x13   : > { %vm221_vm6 = vmand %vm219_vm4, %vm220_vm5 }
  0x14   : > { %v421_v24 = vsel %vm221_vm6, 1.0, %v466_v23 }
  0x15   : > { %v259_v26 = vsel %vm246_vm7, %v421_v24, 0.0 }
  0x27   : > { %235 = vperm.xlu0 %447, %v211_v3  }
  0x9a   : > { %v225_v4 = vpop.xlane.xlu0 %224 }
  0x9b   : > { %v226_v5 = vsub.f32 %v210_v1, %v225_v4 }
  0x9d   : > { %v227_v6 = vmul.f32 1.442695, %v226_v5 }
  0x9f   : > { %448 = vpow2.f32 %v227_v6 }
  0xa2   : > { %v236_v9 = vpop.permute.xlu0 %235 }
  0xa3   : > { %vm237_vm1 = vcmp.eq.s32.totalorder %v518_v8, %v236_v9 }
  0xa4   : > { %v238_v12 = vsel %vm237_vm1, %v226_v5, 0.0 }
  0xa5   : > { %v239_v13 = vsel %vm222_vm0, %v238_v12, 0.0 }
  0xac   : > { %v449_v10 = vpop.eup %448 }
  0xad   : > { %v229_v11 = vsel %vm222_vm0, %v449_v10, 0.0 }
  0xae   : > { %230 = vadd.xlane.f32.xlu1 %v229_v11 }
  0xb2   : > { %240 = vadd.xlane.f32.xlu1 %v239_v13 }
 0x137   : > { %v231_v14 = vpop.xlane.xlu1 %230 }
 0x138   : > { %450 = vlog2.f32 %v231_v14 }
 0x13b   : > { %v241_v20 = vpop.xlane.xlu1 %240 }
 0x145   : > { %v451_v18 = vpop.eup %450 }
 0x146   : > { %v243_v19 = vmul.f32 0.6931472, %v451_v18 }
 0x148   : > { %v244_v21 = vsub.f32 %v243_v19, %v241_v20 }
 0x14a   : > { %v245_v22 = vsel %vm221_vm6, %v244_v21, 0.0 }
 0x14b   : > { %v247_v25 = vsel %vm246_vm7, %v245_v22, 0.0 }
 0x14c   : > { %248 = vadd.xlane.f32.xlu1 %v247_v25 }
 0x150   : > { %260 = vadd.xlane.f32.xlu1 %v259_v26 }
 0x1d5   : > { %v249_v27 = vpop.xlane.xlu1 %248 }
 0x1d6   : > { %v250_v28 = vrot.slane %v249_v27, 4 }
 0x1d8   : > { %v251_v29 = vadd.f32 %v250_v28, %v249_v27 }
 0x1d9   : > { %v261_v30 = vpop.xlane.xlu1 %260 }
 0x1da   : > { %v252_v31 = vrot.slane %v251_v29, 2  ;;  %v262_v32 = vrot.slane %v261_v30, 4 }
 0x1dc   : > { %v263_v33 = vadd.f32 %v262_v32, %v261_v30  ;;  %v253_v34 = vadd.f32 %v252_v31, %v251_v29 }
 0x1de   : > { %v264_v35 = vrot.slane %v263_v33, 2  ;;  %v254_v36 = vrot.slane %v253_v34, 1 }
 0x1e0   : > { %v265_v37 = vadd.f32 %v264_v35, %v263_v33  ;;  %v255_v38 = vadd.f32 %v254_v36, %v253_v34 }
 0x1e2   : > { %427 = vpush %v255_v38  ;;  %v266_v39 = vrot.slane %v265_v37, 1 }
 0x1e4   : > { %v267_v40 = vadd.f32 %v266_v39, %v265_v37 }
 0x1e6   : > { %429 = vpush %v267_v40 }
 0x213   : > { %s428_s29 = spop %427 }
 0x214   : > { %v276_v42 = vstv %s428_s29 }
 0x216   : > { %281 = sbr.rel (%p422_p4) target bundleno = 1066 (0x42a), region = 40 }
 0x217   : > { %s430_s30 = spop %429 }
 0x218   : > { %v274_v41 = vstv %s430_s30 }
 0x219   : > { %v275_v43 = vsel %vm273_vm11, %v274_v41, 0.0 }
 0x21a   : > { %v534_v44 = vsel %vm271_vm12, %v276_v42, %v275_v43 }
 0x21b   : > { %v282_v45 = vld [vmem:[%s563_s2] sm:$0x3]  ;;  %vm284_vm13 = vcmask 58368   ;;  %v467_v47 = vmov 0   ;;  %vm309_vm2 = vcmask 1024   ;;  %v468_v63 = vmov 0.0  }
 0x21c   : > { %v285_v46 = vsel %vm284_vm13, %v282_v45, -inf  ;;  %452 = vset.pattern.permute.xlu0 %v467_v47  ;;  %v283_v48 = vld [vmem:[%s564_s3] sm:$0x3]  ;;  %vm334_vm3 = vcmp.eq.s32.totalorder %v518_v8, 3  ;;  %vm332_vm4 = vcmp.eq.s32.totalorder %v518_v8, 2 }
 0x21d   : > { %286 = vmax.xlane.f32.xlu0 %v285_v46  ;;  %vm302_vm15 = vcmp.ge.s32.totalorder %v283_v48, 0  ;;  %vm303_vm0 = vcmp.lt.s32.totalorder %v283_v48, 8  ;;  %vm335_vm5 = vmand %vm269_vm8, %vm334_vm3 }
 0x21e   : > { %vm304_vm1 = vmand %vm302_vm15, %vm303_vm0 }
 0x21f   : > { %v423_v0 = vsel %vm304_vm1, 1.0, %v468_v63  ;;  %vm333_vm6 = vmand %vm269_vm8, %vm332_vm4 }
 0x220   : > { %v322_v2 = vsel %vm309_vm2, %v423_v0, 0.0 }
 0x233   : > { %295 = vperm.xlu0 %452, %v283_v48  }
 0x2a6   : > { %v287_v49 = vpop.xlane.xlu0 %286 }
 0x2a7   : > { %v288_v50 = vsub.f32 %v282_v45, %v287_v49 }
 0x2a9   : > { %v289_v51 = vmul.f32 1.442695, %v288_v50 }
 0x2ab   : > { %453 = vpow2.f32 %v289_v51 }
 0x2ae   : > { %v296_v52 = vpop.permute.xlu0 %295 }
 0x2af   : > { %vm297_vm14 = vcmp.eq.s32.totalorder %v518_v8, %v296_v52 }
 0x2b0   : > { %v298_v55 = vsel %vm297_vm14, %v288_v50, 0.0 }
 0x2b1   : > { %v299_v56 = vsel %vm284_vm13, %v298_v55, 0.0 }
 0x2b8   : > { %v454_v53 = vpop.eup %453 }
 0x2b9   : > { %v291_v54 = vsel %vm284_vm13, %v454_v53, 0.0 }
 0x2ba   : > { %292 = vadd.xlane.f32.xlu1 %v291_v54 }
 0x2be   : > { %300 = vadd.xlane.f32.xlu1 %v299_v56 }
 0x343   : > { %v293_v57 = vpop.xlane.xlu1 %292 }
 0x344   : > { %455 = vlog2.f32 %v293_v57 }
 0x347   : > { %v301_v60 = vpop.xlane.xlu1 %300 }
 0x351   : > { %v456_v58 = vpop.eup %455 }
 0x352   : > { %v306_v59 = vmul.f32 0.6931472, %v456_v58 }
 0x354   : > { %v307_v61 = vsub.f32 %v306_v59, %v301_v60 }
 0x356   : > { %v308_v62 = vsel %vm304_vm1, %v307_v61, 0.0 }
 0x357   : > { %v310_v1 = vsel %vm309_vm2, %v308_v62, 0.0 }
 0x358   : > { %311 = vadd.xlane.f32.xlu1 %v310_v1 }
 0x35c   : > { %323 = vadd.xlane.f32.xlu1 %v322_v2 }
 0x3e1   : > { %v312_v3 = vpop.xlane.xlu1 %311 }
 0x3e2   : > { %v313_v4 = vrot.slane %v312_v3, 4 }
 0x3e4   : > { %v314_v5 = vadd.f32 %v313_v4, %v312_v3 }
 0x3e5   : > { %v324_v6 = vpop.xlane.xlu1 %323 }
 0x3e6   : > { %v315_v7 = vrot.slane %v314_v5, 2  ;;  %v325_v9 = vrot.slane %v324_v6, 4 }
 0x3e8   : > { %v326_v10 = vadd.f32 %v325_v9, %v324_v6  ;;  %v316_v11 = vadd.f32 %v315_v7, %v314_v5 }
 0x3ea   : > { %v327_v12 = vrot.slane %v326_v10, 2  ;;  %v317_v13 = vrot.slane %v316_v11, 1 }
 0x3ec   : > { %v328_v14 = vadd.f32 %v327_v12, %v326_v10  ;;  %v318_v16 = vadd.f32 %v317_v13, %v316_v11 }
 0x3ee   : > { %431 = vpush %v318_v16  ;;  %v329_v17 = vrot.slane %v328_v14, 1 }
 0x3f0   : > { %v330_v18 = vadd.f32 %v329_v17, %v328_v14 }
 0x3f2   : > { %433 = vpush %v330_v18 }
 0x41f   : > { %s432_s9 = spop %431 }
 0x420   : > { %v338_v20 = vstv %s432_s9 }
 0x423   : > { %s434_s10 = spop %433 }
 0x424   : > { %v336_v19 = vstv %s434_s10 }
 0x425   : > { %v337_v21 = vsel %vm335_vm5, %v336_v19, 0.0 }
 0x426   : > { %v339_v22 = vsel %vm333_vm6, %v338_v20, %v337_v21 }
 0x427   : > { %v340_v23 = vadd.f32 %v339_v22, %v534_v44 }
 0x429   : > { %341 = vst [vmem:[%s512_s24] sm:$0xff] %v340_v23 }
 0x42a PF: > { %p424_p5 = scmp.eq.s32.totalorder %s500_s16, 0 }
 0x42c   : > { %345 = sbr.rel (%p424_p5) target bundleno = 1074 (0x432), region = 44 }
 0x431   : > { %346 = vst [vmem:[%s512_s24] sm:$0xff] %v534_v44 }
 0x432 PF: > { %s14_s15 = sadd.s32 1, %s463_s15  }
 0x433   : > { %p11_p6 = scmp.ge.s32.totalorder %s14_s15, 4  }
 0x435   :  { %13 = sbr.rel (!%p11_p6) target bundleno = 1 (0x1), region = 77 }

</bundles_post_ra>
